<compile_context>
chip_gen: v7x
topology: tpu7x:2x2x1
jax: 0.10.0
libtpu: 0.0.40
codegen_flags: <defaults>
</compile_context>

<pallas_src>
import functools

import jax
import jax.numpy as jnp
from jax.experimental import pallas as pl
from jax.experimental.pallas import tpu as pltpu


def _round_up(x, m):
    return (x + m - 1) // m * m


# --------------------------- hardware introspection ---------------------------
@functools.lru_cache(maxsize=None)
def _hw_info():
    """Returns (generation, vmem_capacity_bytes, roofline_TM_bf16, cores/chip)."""
    kind = ""
    try:
        kind = jax.devices()[0].device_kind.lower()
    except Exception:
        pass
    vmem = None
    try:
        vmem = int(pltpu.get_tpu_info().vmem_capacity_bytes)
    except Exception:
        vmem = None
    # roofline TM (bf16):  peak_flops / hbm_bw  ->  rounded to a clean tile.
    if "v7" in kind:
        gen, dflt_vmem, tm_target, cores = "v7x", 64 << 20, 384, 2
    elif "v6" in kind:
        gen, dflt_vmem, tm_target, cores = "v6e", 128 << 20, 768, 1
    elif "v5" in kind:
        gen, dflt_vmem, tm_target, cores = "v5e", 128 << 20, 256, 1
    else:
        gen, dflt_vmem, tm_target, cores = "unknown", 64 << 20, 512, 1
    if vmem is None:
        vmem = dflt_vmem
    return gen, vmem, tm_target, cores


@functools.lru_cache(maxsize=None)
def _tile_config(M, Hp, x_bytes, o_bytes):
    """Generation- and dtype-aware tiling: (TM, TK, n_sub, Mp, buffered_xo, vmem_limit)."""
    _, vmem_cap, tm_target, cores = _hw_info()

    # sublane packing tile for the token axis (8/16/32 for 4/2/1-byte dtypes)
    sub = {1: 32, 2: 16, 4: 8}[x_bytes]

    TK = 512 if Hp % 512 == 0 else 256      # full 256-wide MXU columns per L1 slab
    n_sub = 2                               # overlap L1(MXU) with GELU(EUP)/L2(MXU)
    ck = TK // n_sub

    # VMEM budget: stay below physical capacity with headroom for compiler scratch.
    margin = (8 << 20) if vmem_cap <= (64 << 20) else (16 << 20)
    vmem_limit = vmem_cap - margin          # ~112 MiB on v5e/v6e, ~56 MiB on v7x
    budget = vmem_limit - (4 << 20)

    w_bytes = x_bytes                       # weights held in the compute dtype (bf16)
    fixed = 2 * (2 * w_bytes * Hp * TK) + 2 * 4 * (TK + Hp)  # dbl-buffered w1/w2 + biases

    def _max_tm(nbuf_xo):
        # acc f32 + x/out slabs (nbuf each) + f32 h temp per row.
        per_row = 4 * Hp + nbuf_xo * (x_bytes + o_bytes) * Hp + 4 * ck
        t = max(0, budget - fixed) // per_row
        return max(sub, t // sub * sub)

    buffered_xo = 2
    tm_cap = _max_tm(2)
    if tm_cap < tm_target:                  # tight VMEM (v7x / f32 out): single-buffer x/out
        tm_single = _max_tm(1)
        if tm_single > tm_cap:
            buffered_xo, tm_cap = 1, tm_single

    TM = min(tm_target, tm_cap, _round_up(M, sub))
    if cores >= 2 and M >= 2 * sub:         # megacore: keep >= 2 parallel token tiles
        TM = min(TM, _round_up((M + 1) // 2, sub))
    TM = max(TM, sub)
    Mp = _round_up(M, TM)
    return TM, TK, n_sub, Mp, buffered_xo, int(vmem_limit)


# ----------------------------- Pallas kernel ----------------------------------
def _mlp_head_kernel(x_ref, w1_ref, b1_ref, w2_ref, b2_ref, o_ref, acc_ref, *, n_sub):
    """Fused 2-layer MLP head, tiled over (M tokens, K hidden slab).

    grid = (Mp/TM [parallel], Hp/TK [arbitrary, reduction])
      x_ref : (TM, Hp)   token slab (resident across k)
      w1_ref: (Hp, TK)   k-th column slab of layer-1 weight  (bf16)
      b1_ref: (1,  TK)   f32
      w2_ref: (TK, Hp)   k-th row slab of layer-2 weight     (bf16)
      b2_ref: (1,  Hp)   f32 (resident)
      o_ref : (TM, Hp)   written once on the final k step
      acc_ref: VMEM (TM, Hp) f32 accumulator
    The TK slab is processed in n_sub sub-chunks (unrolled) so the MXU work of
    one chunk overlaps the GELU (VPU/EUP) of the previous one.
    """
    k = pl.program_id(1)

    @pl.when(k == 0)
    def _init():
        acc_ref[...] = jnp.zeros_like(acc_ref)

    x = x_ref[...]
    ck = w1_ref.shape[1] // n_sub

    def _chunk(j, carry):
        off = pl.multiple_of(j * ck, ck)
        # Layer-1 partial activation: native bf16 operands on the MXU, f32 acc.
        h = jnp.dot(x, w1_ref[:, pl.ds(off, ck)],
                    preferred_element_type=jnp.float32)
        h = jax.nn.gelu(h + b1_ref[:, pl.ds(off, ck)])
        # Layer-2 contribution of this hidden sub-chunk (accumulated on-chip).
        # NOTE: float weights only; integer dtypes are not supported here.
        acc_ref[...] += jnp.dot(h.astype(w2_ref.dtype),
                                w2_ref[pl.ds(off, ck), :],
                                preferred_element_type=jnp.float32)
        return carry

    jax.lax.fori_loop(0, n_sub, _chunk, 0, unroll=True)

    @pl.when(k == pl.num_programs(1) - 1)
    def _store():
        o_ref[...] = (acc_ref[...] + b2_ref[...]).astype(o_ref.dtype)


# ------------------------------ wrapper call -----------------------------------
@functools.partial(
    jax.jit,
    static_argnames=("H", "TM", "TK", "n_sub", "Mp", "buffered_xo", "vmem_limit"))
def _mlp_head_call(x2d, w1p, b1p, w2p, b2p, *,
                   H, TM, TK, n_sub, Mp, buffered_xo, vmem_limit):
    M = x2d.shape[0]
    Hp = w1p.shape[0]
    cdt = w1p.dtype                       # bf16 compute dtype for MXU operands
    out_dtype = x2d.dtype

    # Only the (small) activation is padded per call; weights were padded once.
    xp = jnp.pad(x2d.astype(cdt), ((0, Mp - M), (0, Hp - H)))

    x_bytes = jnp.dtype(cdt).itemsize
    o_bytes = jnp.dtype(out_dtype).itemsize
    passes = Mp // TM                     # weights are re-streamed once per token tile
    cost = pl.CostEstimate(
        flops=4 * Mp * Hp * Hp,           # two (Mp,Hp)x(Hp,Hp) matmuls
        transcendentals=Mp * Hp,          # GELU
        bytes_accessed=int(Mp * Hp * (x_bytes + o_bytes)
                           + passes * (w1p.size + w2p.size) * x_bytes
                           + passes * (b1p.size + b2p.size) * 4),
    )

    # x / out only change once per Mp/TM i-steps; when VMEM is tight (v7x)
    # single-buffer them and hide the exposed DMA behind the long k loop.
    xo_kw = {} if buffered_xo == 2 else {"pipeline_mode": pl.Buffered(buffered_xo)}

    out = pl.pallas_call(
        functools.partial(_mlp_head_kernel, n_sub=n_sub),
        out_shape=jax.ShapeDtypeStruct((Mp, Hp), out_dtype),
        grid_spec=pltpu.PrefetchScalarGridSpec(
            num_scalar_prefetch=0,
            grid=(Mp // TM, Hp // TK),
            in_specs=[
                pl.BlockSpec((TM, Hp), lambda i, k: (i, 0), **xo_kw),   # x slab
                pl.BlockSpec((Hp, TK), lambda i, k: (0, k)),            # w1 column slab
                pl.BlockSpec((1, TK),  lambda i, k: (0, k)),            # b1 slab
                pl.BlockSpec((TK, Hp), lambda i, k: (k, 0)),            # w2 row slab
                pl.BlockSpec((1, Hp),  lambda i, k: (0, 0)),            # b2 (resident)
            ],
            out_specs=pl.BlockSpec((TM, Hp), lambda i, k: (i, 0), **xo_kw),
            scratch_shapes=[pltpu.VMEM((TM, Hp), jnp.float32)],
        ),
        compiler_params=pltpu.CompilerParams(
            dimension_semantics=("parallel", "arbitrary"),
            vmem_limit_bytes=int(vmem_limit),
        ),
        cost_estimate=cost,
    )(xp, w1p, b1p, w2p, b2p)

    return out[:M, :H]


def mlp_head_forward(x, w1p, b1p, w2p, b2p, H):
    """x: [B, S, H] -> [B, S, H]; both matmuls + GELU fused in one Pallas call."""
    B, S, _ = x.shape
    M = B * S
    Hp = w1p.shape[0]
    TM, TK, n_sub, Mp, buffered_xo, vmem_limit = _tile_config(
        M, Hp, jnp.dtype(w1p.dtype).itemsize, jnp.dtype(x.dtype).itemsize)
    out2d = _mlp_head_call(x.reshape(M, H), w1p, b1p, w2p, b2p,
                           H=H, TM=TM, TK=TK, n_sub=n_sub, Mp=Mp,
                           buffered_xo=buffered_xo, vmem_limit=vmem_limit)
    return out2d.reshape(B, S, H)


# -------------------- DistributedModuleEngine (JAX/Pallas) --------------------
class WrappedMLPModule:
    """Stands in for the engine-wrapped model; `.module` mirrors DeepSpeed's
    engine.module attribute so both train/eval delegation paths resolve here.

    Weights are padded to the MXU-friendly hidden size and cast to bf16 ONCE
    here (not per forward call), so the steady-state kernel is pure
    weight-streaming with no per-call HBM weight rewrite."""

    def __init__(self, w1, b1, w2, b2, compute_dtype=jnp.bfloat16):
        H = int(w1.shape[0])
        Hp = _round_up(H, 256)   # lane-dense + full 256-wide MXU columns on v6e/v7x
        self.H, self.Hp = H, Hp
        pad2 = ((0, Hp - H), (0, Hp - H))
        padb = ((0, 0), (0, Hp - H))
        # Zero padding is numerically safe: gelu(0 + 0) == 0 and the padded w2
        # rows / output columns are zero, so padding contributes exactly 0.
        self.w1p = jnp.pad(jnp.asarray(w1, compute_dtype), pad2)
        self.w2p = jnp.pad(jnp.asarray(w2, compute_dtype), pad2)
        self.b1p = jnp.pad(jnp.asarray(b1, jnp.float32).reshape(1, H), padb)
        self.b2p = jnp.pad(jnp.asarray(b2, jnp.float32).reshape(1, H), padb)
        self.module = self       # eval path: self.module.module(*inputs)

    def __call__(self, x):
        return mlp_head_forward(x, self.w1p, self.b1p, self.w2p, self.b2p, self.H)

    def forward_value(self, x):
        return self(x)


class DistributedModuleEngine:
    """Faithful forward() semantics of the PyTorch wrapper."""

    def __init__(self, module, place_policy=None, current_model=None):
        self.module = module
        self._place_policy = place_policy
        self._current_model = current_model
        self._is_training = False

    def forward(self, *inputs, **kwargs):
        if self.module is not None:
            if self._is_training:
                return self.module(*inputs, **kwargs)
            else:
                return self.module.module(*inputs, **kwargs)
        else:
            return None

    __call__ = forward

    def forward_value(self, *inputs, **kwargs):
        if self.module is not None:
            return self.module.forward_value(*inputs, **kwargs)
        return None

    def eval(self):
        self._is_training = False

    def train(self):
        self._is_training = True

    # TODO(synk): _all_to_all_single / all_gather_device_data_list /
    # _scatter_device_data / _forward are host-side torch.distributed + cuda
    # stream orchestration with no tensor compute; on a single TPU process
    # they are identity passthroughs and are not lowered to Pallas.


# ----------------------------------- main --------------------------------------
if __name__ == "__main__":
    B, S, H = 2, 8, 32
    key = jax.random.PRNGKey(0)
    kx, kw1, kw2 = jax.random.split(key, 3)

    x = jax.random.normal(kx, (B, S, H), dtype=jnp.float32)
    w1 = jax.random.normal(kw1, (H, H), dtype=jnp.float32) * 0.05
    b1 = jnp.zeros((H,), dtype=jnp.float32)
    w2 = jax.random.normal(kw2, (H, H), dtype=jnp.float32) * 0.05
    b2 = jnp.zeros((H,), dtype=jnp.float32)

    wrapped = WrappedMLPModule(w1, b1, w2, b2)
    engine = DistributedModuleEngine(wrapped, place_policy=None, current_model=None)

    # eval path -> module.module(x)
    out = jax.block_until_ready(engine(x))

    # train path -> module(x) (same underlying kernel)
    engine.train()
    out_train = jax.block_until_ready(engine(x))
    engine.eval()

    # Cross-check against a plain-JAX reference using the same bf16-rounded
    # operands the kernel sees (f32 accumulation in both).
    xb = x.astype(jnp.bfloat16).astype(jnp.float32).reshape(B * S, H)
    w1b = w1.astype(jnp.bfloat16).astype(jnp.float32)
    w2b = w2.astype(jnp.bfloat16).astype(jnp.float32)
    h = jax.nn.gelu(jnp.dot(xb, w1b) + b1)
    h = h.astype(jnp.bfloat16).astype(jnp.float32)
    ref = (jnp.dot(h, w2b) + b2).reshape(B, S, H)

    assert jnp.allclose(out, ref, atol=5e-3, rtol=5e-2), \
        f"max abs diff {jnp.max(jnp.abs(out - ref))}"
    assert jnp.allclose(out_train, ref, atol=5e-3, rtol=5e-2)

    # Module-is-None path must return None, exactly like the PyTorch wrapper.
    assert DistributedModuleEngine(None)(x) is None

    print("KERNEL_OK")
</pallas_src>

<mosaic_0001>
module attributes {stable_mosaic.version = 11 : i64} {
  func.func @_mlp_head_kernel(%arg0: i32, %arg1: i32, %arg2: memref<16x256xbf16, #tpu.memory_space<vmem>>, %arg3: memref<256x256xbf16, #tpu.memory_space<vmem>>, %arg4: memref<1x256xf32, #tpu.memory_space<vmem>>, %arg5: memref<256x256xbf16, #tpu.memory_space<vmem>>, %arg6: memref<1x256xf32, #tpu.memory_space<vmem>>, %arg7: memref<16x256xf32, #tpu.memory_space<vmem>>, %arg8: memref<16x256xf32, #tpu.memory_space<vmem>>) attributes {dimension_semantics = [#tpu.dimension_semantics<parallel>, #tpu.dimension_semantics<arbitrary>], iteration_bounds = array<i64: 1, 1>, scalar_prefetch = 0 : i64, scratch_operands = 1 : i64, tpu.core_type = #tpu.core_type<tc>, window_params = [{transform_indices = @transform_0, window_bounds = array<i64: 16, 256>}, {transform_indices = @transform_1, window_bounds = array<i64: 256, 256>}, {transform_indices = @transform_2, window_bounds = array<i64: 1, 256>}, {transform_indices = @transform_3, window_bounds = array<i64: 256, 256>}, {pipeline_mode = #tpu.pipeline_mode<synchronous>, transform_indices = @transform_4, window_bounds = array<i64: 1, 256>}, {transform_indices = @transform_5, window_bounds = array<i64: 16, 256>}]} {
    %c0_i32 = arith.constant 0 : i32
    %0 = arith.cmpi eq, %arg1, %c0_i32 : i32
    %1 = arith.extui %0 : i1 to i32
    %c0_i32_0 = arith.constant 0 : i32
    %2 = arith.cmpi ne, %1, %c0_i32_0 : i32
    scf.if %2 {
      %cst_31 = arith.constant 0.000000e+00 : f32
      %65 = vector.broadcast %cst_31 : f32 to vector<16x256xf32>
      %c0_32 = arith.constant 0 : index
      %c0_33 = arith.constant 0 : index
      %66 = vector.load %arg8[%c0_32, %c0_33] : memref<16x256xf32, #tpu.memory_space<vmem>>, vector<16x256xf32>
      tpu.vector_store %arg8[%c0_32, %c0_33], %65 {strides = array<i32>} : memref<16x256xf32, #tpu.memory_space<vmem>>, vector<16x256xf32>,
    } else {
    }
    %c0 = arith.constant 0 : index
    %c0_1 = arith.constant 0 : index
    %3 = vector.load %arg2[%c0, %c0_1] : memref<16x256xbf16, #tpu.memory_space<vmem>>, vector<16x256xbf16>
    %c0_i32_2 = arith.constant 0 : i32
    %c128_i32 = arith.constant 128 : i32
    %4 = arith.muli %c0_i32_2, %c128_i32 : i32
    %5 = tpu.assume_multiple %4, 128 : i32
    %c0_3 = arith.constant 0 : index
    %6 = arith.index_cast %5 : i32 to index
    %7 = vector.load %arg3[%c0_3, %6] : memref<256x256xbf16, #tpu.memory_space<vmem>>, vector<256x128xbf16>
    %cst = arith.constant dense<0.000000e+00> : vector<16x128xf32>
    %8 = tpu.matmul %3, %7, %cst {dimension_numbers = #tpu.dot_dimension_numbers<[1], [0], [0], [1], [0, 0, 1, 1], [], []>} : vector<16x256xbf16>, vector<256x128xbf16>, vector<16x128xf32> -> vector<16x128xf32>
    %c0_4 = arith.constant 0 : index
    %9 = arith.index_cast %5 : i32 to index
    %10 = vector.load %arg4[%c0_4, %9] : memref<1x256xf32, #tpu.memory_space<vmem>>, vector<1x128xf32>
    %11 = vector.broadcast %10 : vector<1x128xf32> to vector<16x128xf32>
    %12 = arith.addf %8, %11 : vector<16x128xf32>
    %13 = arith.mulf %12, %12 : vector<16x128xf32>
    %14 = arith.mulf %12, %13 : vector<16x128xf32>
    %cst_5 = arith.constant 4.471500e-02 : f32
    %15 = vector.broadcast %cst_5 : f32 to vector<16x128xf32>
    %16 = arith.mulf %15, %14 : vector<16x128xf32>
    %17 = arith.addf %12, %16 : vector<16x128xf32>
    %cst_6 = arith.constant 0.797884583 : f32
    %18 = vector.broadcast %cst_6 : f32 to vector<16x128xf32>
    %19 = arith.mulf %18, %17 : vector<16x128xf32>
    %20 = math.tanh %19 : vector<16x128xf32>
    %cst_7 = arith.constant 1.000000e+00 : f32
    %21 = vector.broadcast %cst_7 : f32 to vector<16x128xf32>
    %22 = arith.addf %21, %20 : vector<16x128xf32>
    %cst_8 = arith.constant 5.000000e-01 : f32
    %23 = vector.broadcast %cst_8 : f32 to vector<16x128xf32>
    %24 = arith.mulf %23, %22 : vector<16x128xf32>
    %25 = arith.mulf %12, %24 : vector<16x128xf32>
    %c0_9 = arith.constant 0 : index
    %c0_10 = arith.constant 0 : index
    %26 = vector.load %arg8[%c0_9, %c0_10] : memref<16x256xf32, #tpu.memory_space<vmem>>, vector<16x256xf32>
    %27 = arith.truncf %25 : vector<16x128xf32> to vector<16x128xbf16>
    %28 = arith.index_cast %5 : i32 to index
    %c0_11 = arith.constant 0 : index
    %29 = vector.load %arg5[%28, %c0_11] : memref<256x256xbf16, #tpu.memory_space<vmem>>, vector<128x256xbf16>
    %cst_12 = arith.constant dense<0.000000e+00> : vector<16x256xf32>
    %30 = tpu.matmul %27, %29, %cst_12 {dimension_numbers = #tpu.dot_dimension_numbers<[1], [0], [0], [1], [0, 0, 1, 1], [], []>} : vector<16x128xbf16>, vector<128x256xbf16>, vector<16x256xf32> -> vector<16x256xf32>
    %31 = arith.addf %26, %30 : vector<16x256xf32>
    %c0_13 = arith.constant 0 : index
    %c0_14 = arith.constant 0 : index
    %32 = vector.load %arg8[%c0_13, %c0_14] : memref<16x256xf32, #tpu.memory_space<vmem>>, vector<16x256xf32>
    tpu.vector_store %arg8[%c0_13, %c0_14], %31 {strides = array<i32>} : memref<16x256xf32, #tpu.memory_space<vmem>>, vector<16x256xf32>,
    %c1_i32 = arith.constant 1 : i32
    %c128_i32_15 = arith.constant 128 : i32
    %33 = arith.muli %c1_i32, %c128_i32_15 : i32
    %34 = tpu.assume_multiple %33, 128 : i32
    %c0_16 = arith.constant 0 : index
    %35 = arith.index_cast %34 : i32 to index
    %36 = vector.load %arg3[%c0_16, %35] : memref<256x256xbf16, #tpu.memory_space<vmem>>, vector<256x128xbf16>
    %cst_17 = arith.constant dense<0.000000e+00> : vector<16x128xf32>
    %37 = tpu.matmul %3, %36, %cst_17 {dimension_numbers = #tpu.dot_dimension_numbers<[1], [0], [0], [1], [0, 0, 1, 1], [], []>} : vector<16x256xbf16>, vector<256x128xbf16>, vector<16x128xf32> -> vector<16x128xf32>
    %c0_18 = arith.constant 0 : index
    %38 = arith.index_cast %34 : i32 to index
    %39 = vector.load %arg4[%c0_18, %38] : memref<1x256xf32, #tpu.memory_space<vmem>>, vector<1x128xf32>
    %40 = vector.broadcast %39 : vector<1x128xf32> to vector<16x128xf32>
    %41 = arith.addf %37, %40 : vector<16x128xf32>
    %42 = arith.mulf %41, %41 : vector<16x128xf32>
    %43 = arith.mulf %41, %42 : vector<16x128xf32>
    %cst_19 = arith.constant 4.471500e-02 : f32
    %44 = vector.broadcast %cst_19 : f32 to vector<16x128xf32>
    %45 = arith.mulf %44, %43 : vector<16x128xf32>
    %46 = arith.addf %41, %45 : vector<16x128xf32>
    %cst_20 = arith.constant 0.797884583 : f32
    %47 = vector.broadcast %cst_20 : f32 to vector<16x128xf32>
    %48 = arith.mulf %47, %46 : vector<16x128xf32>
    %49 = math.tanh %48 : vector<16x128xf32>
    %cst_21 = arith.constant 1.000000e+00 : f32
    %50 = vector.broadcast %cst_21 : f32 to vector<16x128xf32>
    %51 = arith.addf %50, %49 : vector<16x128xf32>
    %cst_22 = arith.constant 5.000000e-01 : f32
    %52 = vector.broadcast %cst_22 : f32 to vector<16x128xf32>
    %53 = arith.mulf %52, %51 : vector<16x128xf32>
    %54 = arith.mulf %41, %53 : vector<16x128xf32>
    %c0_23 = arith.constant 0 : index
    %c0_24 = arith.constant 0 : index
    %55 = vector.load %arg8[%c0_23, %c0_24] : memref<16x256xf32, #tpu.memory_space<vmem>>, vector<16x256xf32>
    %56 = arith.truncf %54 : vector<16x128xf32> to vector<16x128xbf16>
    %57 = arith.index_cast %34 : i32 to index
    %c0_25 = arith.constant 0 : index
    %58 = vector.load %arg5[%57, %c0_25] : memref<256x256xbf16, #tpu.memory_space<vmem>>, vector<128x256xbf16>
    %cst_26 = arith.constant dense<0.000000e+00> : vector<16x256xf32>
    %59 = tpu.matmul %56, %58, %cst_26 {dimension_numbers = #tpu.dot_dimension_numbers<[1], [0], [0], [1], [0, 0, 1, 1], [], []>} : vector<16x128xbf16>, vector<128x256xbf16>, vector<16x256xf32> -> vector<16x256xf32>
    %60 = arith.addf %55, %59 : vector<16x256xf32>
    %c0_27 = arith.constant 0 : index
    %c0_28 = arith.constant 0 : index
    %61 = vector.load %arg8[%c0_27, %c0_28] : memref<16x256xf32, #tpu.memory_space<vmem>>, vector<16x256xf32>
    tpu.vector_store %arg8[%c0_27, %c0_28], %60 {strides = array<i32>} : memref<16x256xf32, #tpu.memory_space<vmem>>, vector<16x256xf32>,
    %c2_i32 = arith.constant 2 : i32
    %c0_i32_29 = arith.constant 0 : i32
    %62 = arith.cmpi eq, %arg1, %c0_i32_29 : i32
    %63 = arith.extui %62 : i1 to i32
    %c0_i32_30 = arith.constant 0 : i32
    %64 = arith.cmpi ne, %63, %c0_i32_30 : i32
    scf.if %64 {
      %c0_31 = arith.constant 0 : index
      %c0_32 = arith.constant 0 : index
      %65 = vector.load %arg8[%c0_31, %c0_32] : memref<16x256xf32, #tpu.memory_space<vmem>>, vector<16x256xf32>
      %c0_33 = arith.constant 0 : index
      %c0_34 = arith.constant 0 : index
      %66 = vector.load %arg6[%c0_33, %c0_34] : memref<1x256xf32, #tpu.memory_space<vmem>>, vector<1x256xf32>
      %67 = vector.broadcast %66 : vector<1x256xf32> to vector<16x256xf32>
      %68 = arith.addf %65, %67 : vector<16x256xf32>
      %c0_35 = arith.constant 0 : index
      %c0_36 = arith.constant 0 : index
      %69 = vector.load %arg7[%c0_35, %c0_36] : memref<16x256xf32, #tpu.memory_space<vmem>>, vector<16x256xf32>
      tpu.vector_store %arg7[%c0_35, %c0_36], %68 {strides = array<i32>} : memref<16x256xf32, #tpu.memory_space<vmem>>, vector<16x256xf32>,
    } else {
    }
    return
  }
  func.func @transform_0(%arg0: i32, %arg1: i32) -> (i32, i32) {
    %c0_i32 = arith.constant 0 : i32
    %c0_i32_0 = arith.constant 0 : i32
    return %arg0, %c0_i32 : i32, i32
  }
  func.func @transform_1(%arg0: i32, %arg1: i32) -> (i32, i32) {
    %c0_i32 = arith.constant 0 : i32
    %c0_i32_0 = arith.constant 0 : i32
    return %c0_i32, %arg1 : i32, i32
  }
  func.func @transform_2(%arg0: i32, %arg1: i32) -> (i32, i32) {
    %c0_i32 = arith.constant 0 : i32
    %c0_i32_0 = arith.constant 0 : i32
    return %c0_i32, %arg1 : i32, i32
  }
  func.func @transform_3(%arg0: i32, %arg1: i32) -> (i32, i32) {
    %c0_i32 = arith.constant 0 : i32
    %c0_i32_0 = arith.constant 0 : i32
    return %arg1, %c0_i32 : i32, i32
  }
  func.func @transform_4(%arg0: i32, %arg1: i32) -> (i32, i32) {
    %c0_i32 = arith.constant 0 : i32
    %c0_i32_0 = arith.constant 0 : i32
    %c0_i32_1 = arith.constant 0 : i32
    return %c0_i32, %c0_i32_0 : i32, i32
  }
  func.func @transform_5(%arg0: i32, %arg1: i32) -> (i32, i32) {
    %c0_i32 = arith.constant 0 : i32
    %c0_i32_0 = arith.constant 0 : i32
    return %arg0, %c0_i32 : i32, i32
  }
}

</mosaic_0001>

<bundles_post_ra>
// kernel: _mlp_head_call.1
= control target key start
LH: loop header
LB: loop body
LE: loop exit
PB: predicated region body
PF: predicated region fallthrough
CT: control target
= control target key end

     0   :  { %10 = vsyncpa [#allocation4], 0  ;;  %s1150_s0 = inlined_call_operand.vmem [shape: bf16[16,256], index: 0, kind: input, shape index: {}]   ;;  %s1151_s1 = inlined_call_operand.hbm [shape: bf16[256,256], index: 1, kind: input, shape index: {}]   ;;  %s1152_s2 = inlined_call_operand.vmem [shape: f32[1,256], index: 2, kind: input, shape index: {}]   ;;  %s1153_s3 = inlined_call_operand.hbm [shape: bf16[256,256], index: 3, kind: input, shape index: {}]   ;;  %s1154_s4 = inlined_call_operand.vmem [shape: f32[1,256], index: 4, kind: input, shape index: {}]   ;;  %s1155_s5 = inlined_call_operand.vmem [shape: f32[16,256], index: 5, kind: output, shape index: {}]  }
   0x1   :  { %11 = vsyncpa [#allocation6], 0  ;;  %s1064_s18 = smov [#allocation3]   ;;  %s1016_s22 = scalar_lea.hbm %s1151_s1, 4096 }
   0x2   :  { %s19_s19 = sshll.u32 %s1064_s18, 4  ;;  %p1017_p0 = scmp.ne.s32.totalorder %s1151_s1, %s1016_s22  ;;  %s20_s19 = int_to_ptr.vmem [resolvable:$true] %s19_s19 }
   0x3   :  { %p1020_p1 = scmp.lt.u32.totalorder %s1016_s22, %s1151_s1 }
   0x5   :  { %p1022_p2 = pnand %p1020_p1, %p1017_p0 }
   0x7   :  { %1025 = shalt.err (!%p1022_p2)
}
   0x8   :  { %s1026_s27 = scalar_lea.vmem %s20_s19, 4096  ;;  %p1031_p4 = scmp.lt.s32.totalorder %s20_s19, %s20_s19 }
   0x9   :  { %p1027_p3 = scmp.ne.s32.totalorder %s20_s19, %s1026_s27  ;;  %p1032_p5 = scmp.lt.s32.totalorder %s1026_s27, %s1026_s27 }
   0xb   :  { %p1033_p6 = por %p1032_p5, %p1031_p4 }
   0xd   :  { %p1034_p7 = pnand %p1033_p6, %p1027_p3 }
   0xf   :  { %1037 = shalt.err (!%p1034_p7)
}
  0x10   :  { %s1065_s28 = smov 128   ;;  %s1066_s29 = smov 8  }
  0x11   :  { %25 = dma.hbm_to_vmem [thread:$0]  %s1151_s1, 4096, %s20_s19, [#allocation4], %s1065_s28, %s1065_s28, %s1066_s29  }
  0x12   :  { %s1067_s7 = smov [#allocation5]   ;;  %s1038_s11 = scalar_lea.hbm %s1153_s3, 4096 }
  0x13   :  { %s33_s8 = sshll.u32 %s1067_s7, 4  ;;  %p1039_p8 = scmp.ne.s32.totalorder %s1153_s3, %s1038_s11  ;;  %s34_s8 = int_to_ptr.vmem [resolvable:$true] %s33_s8 }
  0x14   :  { %p1042_p9 = scmp.lt.u32.totalorder %s1038_s11, %s1153_s3 }
  0x16   :  { %p1044_p10 = pnand %p1042_p9, %p1039_p8 }
  0x18   :  { %1047 = shalt.err (!%p1044_p10)
}
  0x19   :  { %s1048_s16 = scalar_lea.vmem %s34_s8, 4096  ;;  %p1053_p12 = scmp.lt.s32.totalorder %s34_s8, %s34_s8 }
  0x1a   :  { %p1049_p11 = scmp.ne.s32.totalorder %s34_s8, %s1048_s16  ;;  %p1054_p13 = scmp.lt.s32.totalorder %s1048_s16, %s1048_s16 }
  0x1c   :  { %p1055_p0 = por %p1054_p13, %p1053_p12 }
  0x1e   :  { %p1056_p1 = pnand %p1055_p0, %p1049_p11 }
  0x20   :  { %1059 = shalt.err (!%p1056_p1)
}
  0x21   :  { %39 = dma.hbm_to_vmem [thread:$0]  %s1153_s3, 4096, %s34_s8, [#allocation6], %s1065_s28, %s1065_s28, %s1066_s29  }
  0x22   :  { %1060 = dma.done.wait [#allocation4], 4096  }
  0x23   :  { %1061 = vsyncadd [#allocation4], 4294963200 }
  0x24   :  { %1062 = dma.done.wait [#allocation6], 4096  }
  0x25   :  { %1063 = vsyncadd [#allocation6], 4294963200  ;;  %v925_v0 = vld [vmem:[#allocation3 + $0x80] ss:$8 sps:$4 sm:$0xff]   ;;  %v927_v2 = vld [vmem:[#allocation3 + $0x90] ss:$8 sps:$4 sm:$0xff]  }
  0x26   :  { %v926_v1 = vld [vmem:[#allocation3] ss:$8 sps:$4 sm:$0xff]   ;;  %872 = vmatprep.subr.bf16.mxu0 %v925_v0  ;;  %v928_v3 = vld [vmem:[#allocation3 + $0x10] ss:$8 sps:$4 sm:$0xff]   ;;  %v943_v11 = vld [vmem:[%s1150_s0 + $0x4] ss:$8 sps:$4 sm:$0xff]  }
  0x27   :  { %873 = vmatpush3.bf16.msra.mxu0 %v926_v1  ;;  %v929_v4 = vld [vmem:[#allocation3 + $0xa0] ss:$8 sps:$4 sm:$0xff]   ;;  %v931_v6 = vld [vmem:[#allocation3 + $0xb0] ss:$8 sps:$4 sm:$0xff]   ;;  %236 = vmatprep.mubr.bf16.mxu0 %v943_v11  ;;  %v944_v17 = vld [vmem:[#allocation3 + $0x84] ss:$8 sps:$4 sm:$0xff]  }
  0x28   :  { %874 = vmatprep.subr.bf16.mxu0 %v927_v2  ;;  %v930_v5 = vld [vmem:[#allocation3 + $0x20] ss:$8 sps:$4 sm:$0xff]   ;;  %v932_v7 = vld [vmem:[#allocation3 + $0x30] ss:$8 sps:$4 sm:$0xff]   ;;  %v945_v19 = vld [vmem:[#allocation3 + $0x4] ss:$8 sps:$4 sm:$0xff]  }
  0x29   :  { %v933_v8 = vld [vmem:[#allocation3 + $0xc0] ss:$8 sps:$4 sm:$0xff]   ;;  %v935_v10 = vld [vmem:[#allocation3 + $0xd0] ss:$8 sps:$4 sm:$0xff]   ;;  %v946_v20 = vld [vmem:[#allocation3 + $0x94] ss:$8 sps:$4 sm:$0xff]  }
  0x2a   :  { %v934_v9 = vld [vmem:[#allocation3 + $0x40] ss:$8 sps:$4 sm:$0xff]   ;;  %v936_v12 = vld [vmem:[#allocation3 + $0x50] ss:$8 sps:$4 sm:$0xff]   ;;  %v947_v21 = vld [vmem:[#allocation3 + $0x14] ss:$8 sps:$4 sm:$0xff]  }
  0x2b   :  { %875 = vmatpush3.bf16.msra.mxu0 %v928_v3  ;;  %v937_v13 = vld [vmem:[#allocation3 + $0xe0] ss:$8 sps:$4 sm:$0xff]   ;;  %v939_v15 = vld [vmem:[#allocation3 + $0xf0] ss:$8 sps:$4 sm:$0xff]   ;;  %v948_v22 = vld [vmem:[#allocation3 + $0xa4] ss:$8 sps:$4 sm:$0xff]  }
  0x2c   :  { %876 = vmatprep.subr.bf16.mxu0 %v929_v4  ;;  %v938_v14 = vld [vmem:[#allocation3 + $0x60] ss:$8 sps:$4 sm:$0xff]   ;;  %v940_v16 = vld [vmem:[#allocation3 + $0x70] ss:$8 sps:$4 sm:$0xff]   ;;  %v949_v23 = vld [vmem:[#allocation3 + $0x24] ss:$8 sps:$4 sm:$0xff]  }
  0x2d   :  { %v941_v18 = vld [vmem:[%s1150_s0] ss:$8 sps:$4 sm:$0xff]   ;;  %v950_v24 = vld [vmem:[#allocation3 + $0xb4] ss:$8 sps:$4 sm:$0xff]   ;;  %v952_v26 = vld [vmem:[#allocation3 + $0xc4] ss:$8 sps:$4 sm:$0xff]  }
  0x2e   :  { %v951_v25 = vld [vmem:[#allocation3 + $0x34] ss:$8 sps:$4 sm:$0xff]   ;;  %v953_v27 = vld [vmem:[#allocation3 + $0x44] ss:$8 sps:$4 sm:$0xff]   ;;  %v962_v35 = vld [vmem:[#allocation5] ss:$8 sps:$4 sm:$0xff]  }
  0x2f   :  { %877 = vmatpush3.bf16.msra.mxu0 %v930_v5  ;;  %v954_v28 = vld [vmem:[#allocation3 + $0xd4] ss:$8 sps:$4 sm:$0xff]   ;;  %v956_v30 = vld [vmem:[#allocation3 + $0xe4] ss:$8 sps:$4 sm:$0xff]   ;;  %v965_v37 = vld [vmem:[#allocation5 + $0x10] ss:$8 sps:$4 sm:$0xff]  }
  0x30   :  { %878 = vmatprep.subr.bf16.mxu0 %v931_v6  ;;  %v955_v29 = vld [vmem:[#allocation3 + $0x54] ss:$8 sps:$4 sm:$0xff]   ;;  %v957_v31 = vld [vmem:[#allocation3 + $0x64] ss:$8 sps:$4 sm:$0xff]   ;;  %v968_v39 = vld [vmem:[#allocation5 + $0x20] ss:$8 sps:$4 sm:$0xff]  }
  0x31   :  { %v958_v32 = vld [vmem:[#allocation3 + $0xf4] ss:$8 sps:$4 sm:$0xff]   ;;  %v960_v34 = vld [vmem:[#allocation5 + $0x4] ss:$8 sps:$4 sm:$0xff]   ;;  %v971_v41 = vld [vmem:[#allocation5 + $0x30] ss:$8 sps:$4 sm:$0xff]  }
  0x32   :  { %v959_v33 = vld [vmem:[#allocation3 + $0x74] ss:$8 sps:$4 sm:$0xff]   ;;  %367 = vmatprep.subr.bf16.mxu1 %v960_v34  ;;  %v966_v38 = vld [vmem:[#allocation5 + $0x24] ss:$8 sps:$4 sm:$0xff]   ;;  %v974_v43 = vld [vmem:[#allocation5 + $0x40] ss:$8 sps:$4 sm:$0xff]  }
  0x33   :  { %879 = vmatpush3.bf16.msra.mxu0 %v932_v7  ;;  %368 = vmatpush1.bf16.msra.mxu1 %v962_v35  ;;  %v963_v36 = vld [vmem:[#allocation5 + $0x14] ss:$8 sps:$4 sm:$0xff]   ;;  %v972_v42 = vld [vmem:[#allocation5 + $0x44] ss:$8 sps:$4 sm:$0xff]   ;;  %v977_v45 = vld [vmem:[#allocation5 + $0x50] ss:$8 sps:$4 sm:$0xff]  }
  0x34   :  { %880 = vmatprep.subr.bf16.mxu0 %v933_v8  ;;  %369 = vmatprep.subr.bf16.mxu1 %v963_v36  ;;  %v969_v40 = vld [vmem:[#allocation5 + $0x34] ss:$8 sps:$4 sm:$0xff]   ;;  %v978_v46 = vld [vmem:[#allocation5 + $0x64] ss:$8 sps:$4 sm:$0xff]   ;;  %v980_v47 = vld [vmem:[#allocation5 + $0x60] ss:$8 sps:$4 sm:$0xff]  }
  0x35   :  { %v975_v44 = vld [vmem:[#allocation5 + $0x54] ss:$8 sps:$4 sm:$0xff]   ;;  %v983_v49 = vld [vmem:[#allocation5 + $0x70] ss:$8 sps:$4 sm:$0xff]   ;;  %v986_v50 = vld [vmem:[#allocation5 + $0x84] ss:$8 sps:$4 sm:$0xff]  }
  0x36   :  { %v981_v48 = vld [vmem:[#allocation5 + $0x74] ss:$8 sps:$4 sm:$0xff]   ;;  %v1068_v51 = vmov 0   ;;  %v803_v53 = vld [vmem:[%s1152_s2] ss:$0 sm:$0xff] }
  0x37   :  { %881 = vmatpush3.bf16.msra.mxu0 %v934_v9  ;;  %370 = vmatpush1.bf16.msra.mxu1 %v965_v37  ;;  %v990_v34 = vld [vmem:[#allocation5 + $0xa0] ss:$8 sps:$4 sm:$0xff]   ;;  %v995_v35 = vld [vmem:[#allocation5 + $0xb4] ss:$8 sps:$4 sm:$0xff]  }
  0x38   :  { %882 = vmatprep.subr.bf16.mxu0 %v935_v10  ;;  %371 = vmatprep.subr.bf16.mxu1 %v966_v38 }
  0x39   :  { %399 = vmatprep.mubr.bf16.mxu1 %v1068_v51 }
  0x3b   :  { %883 = vmatpush3.bf16.msra.mxu0 %v936_v12  ;;  %372 = vmatpush1.bf16.msra.mxu1 %v968_v39 }
  0x3c   :  { %884 = vmatprep.subr.bf16.mxu0 %v937_v13  ;;  %373 = vmatprep.subr.bf16.mxu1 %v969_v40  ;;  %v993_v40 = vld [vmem:[#allocation5 + $0xb0] ss:$8 sps:$4 sm:$0xff]  }
  0x3f   :  { %885 = vmatpush3.bf16.msra.mxu0 %v938_v14  ;;  %374 = vmatpush1.bf16.msra.mxu1 %v971_v41  ;;  %v839_v14 = vld [vmem:[%s1152_s2 + $0x1] ss:$0 sm:$0xff]  ;;  %v998_v41 = vld [vmem:[#allocation5 + $0xc4] ss:$8 sps:$4 sm:$0xff]  }
  0x40   :  { %886 = vmatprep.subr.bf16.mxu0 %v939_v15  ;;  %375 = vmatprep.subr.bf16.mxu1 %v972_v42 }
  0x43   :  { %887 = vmatpush3.bf16.msra.mxu0 %v940_v16  ;;  %376 = vmatpush1.bf16.msra.mxu1 %v974_v43  ;;  %v996_v43 = vld [vmem:[#allocation5 + $0xc0] ss:$8 sps:$4 sm:$0xff]  }
  0x44   :  { %894 = vmatprep.subr.bf16.mxu0 %v944_v17  ;;  %377 = vmatprep.subr.bf16.mxu1 %v975_v44  ;;  %v1001_v44 = vld [vmem:[#allocation5 + $0xd4] ss:$8 sps:$4 sm:$0xff]  }
  0x46   :  { %237 = vmatmul.mubr.bf16.vlgmr.msra.gmra.mrb[0].mxu0 %v941_v18 }
  0x47   :  { %895 = vmatpush3.bf16.msra.mxu0 %v945_v19  ;;  %587 = vmatprep.mubr.bf16.mxu0 %v943_v11 }
  0x48   :  { %896 = vmatprep.subr.bf16.mxu0 %v946_v20  ;;  %378 = vmatpush1.bf16.msra.mxu1 %v977_v45  ;;  %v984_v20 = vld [vmem:[#allocation5 + $0x80] ss:$8 sps:$4 sm:$0xff]   ;;  %v999_v45 = vld [vmem:[#allocation5 + $0xd0] ss:$8 sps:$4 sm:$0xff]  }
  0x49   :  { %379 = vmatprep.subr.bf16.mxu1 %v978_v46  ;;  %v1004_v46 = vld [vmem:[#allocation5 + $0xe4] ss:$8 sps:$4 sm:$0xff]  }
  0x4b   :  { %897 = vmatpush3.bf16.msra.mxu0 %v947_v21 }
  0x4c   :  { %898 = vmatprep.subr.bf16.mxu0 %v948_v22  ;;  %380 = vmatpush1.bf16.msra.mxu1 %v980_v47 }
  0x4d   :  { %381 = vmatprep.subr.bf16.mxu1 %v981_v48  ;;  %v1002_v48 = vld [vmem:[#allocation5 + $0xe0] ss:$8 sps:$4 sm:$0xff]  }
  0x4f   :  { %899 = vmatpush3.bf16.msra.mxu0 %v949_v23  ;;  %v989_v23 = vld [vmem:[#allocation5 + $0x94] ss:$8 sps:$4 sm:$0xff]  }
  0x50   :  { %900 = vmatprep.subr.bf16.mxu0 %v950_v24  ;;  %382 = vmatpush1.bf16.msra.mxu1 %v983_v49  ;;  %v1007_v49 = vld [vmem:[#allocation5 + $0xf4] ss:$8 sps:$4 sm:$0xff]  }
  0x51   :  { %718 = vmatprep.subr.bf16.mxu1 %v986_v50 }
  0x53   :  { %901 = vmatpush3.bf16.msra.mxu0 %v951_v25 }
  0x54   :  { %902 = vmatprep.subr.bf16.mxu0 %v952_v26 }
  0x57   :  { %903 = vmatpush3.bf16.msra.mxu0 %v953_v27 }
  0x58   :  { %904 = vmatprep.subr.bf16.mxu0 %v954_v28  ;;  %v987_v28 = vld [vmem:[#allocation5 + $0x90] ss:$8 sps:$4 sm:$0xff]  }
  0x5b   :  { %905 = vmatpush3.bf16.msra.mxu0 %v955_v29  ;;  %v992_v29 = vld [vmem:[#allocation5 + $0xa4] ss:$8 sps:$4 sm:$0xff]  }
  0x5c   :  { %906 = vmatprep.subr.bf16.mxu0 %v956_v30 }
  0x5f   :  { %907 = vmatpush3.bf16.msra.mxu0 %v957_v31 }
  0x60   :  { %908 = vmatprep.subr.bf16.mxu0 %v958_v32 }
  0x63   :  { %909 = vmatpush3.bf16.msra.mxu0 %v959_v33 }
  0x66   :  { %588 = vmatmul.mubr.bf16.vlgmr.msra.gmra.mrb[4].mxu0 %v941_v18 }
 0x119   :  { %v888_v52 = vpop.f32.mrb[0].mxu0 }
 0x11a   :  { %v889_v54 = vpop.f32.mrb[1].mxu0 }
 0x11b   :  { %v890_v55 = vadd.f32 %v889_v54, %v888_v52  ;;  %v891_v56 = vpop.f32.mrb[2].mxu0  ;;  %v1005_v54 = vld [vmem:[#allocation5 + $0xf0] ss:$8 sps:$4 sm:$0xff]  }
 0x11c   :  { %v892_v57 = vpop.f32.mrb[3].mxu0 }
 0x11d   :  { %v239_v58 = vadd.f32 %v890_v55, %v803_v53  ;;  %v893_v59 = vadd.f32 %v892_v57, %v891_v56 }
 0x11f   :  { %v245_v60 = vmul.f32 %v239_v58, %v239_v58  ;;  %v242_v61 = vadd.f32 %v893_v59, %v803_v53  ;;  %v778_v59 = vlaneseq }
 0x121   :  { %v247_v62 = vmul.f32 %v245_v60, %v239_v58  ;;  %v246_v63 = vmul.f32 %v242_v61, %v242_v61  ;;  %v779_v60 = vshrl.u32 %v778_v59, 7 }
 0x123   :  { %v249_v0 = vmul.f32 0.044715, %v247_v62  ;;  %v248_v1 = vmul.f32 %v246_v63, %v242_v61  ;;  %v776_v62 = vld [vmem:[%s1154_s4] sm:$0x3]  ;;  %v784_v63 = vsub.s32 1, %v779_v60 }
 0x125   :  { %v251_v2 = vadd.f32 %v249_v0, %v239_v58  ;;  %v250_v3 = vmul.f32 0.044715, %v248_v1  ;;  %v785_v1 = vrot.slane %v776_v62, %v784_v63 }
 0x127   :  { %v253_v4 = vmul.f32 0.7978846, %v251_v2  ;;  %v252_v5 = vadd.f32 %v250_v3, %v242_v61 }
 0x129   :  { %v254_v6 = vmul.f32 0.7978846, %v252_v5  ;;  %1008 = vtanh.f32 %v253_v4 }
 0x12b   :  { %1010 = vtanh.f32 %v254_v6 }
 0x133   :  { %v1009_v7 = vpop.eup %1008 }
 0x134   :  { %v257_v8 = vadd.f32 1.0, %v1009_v7 }
 0x135   :  { %v1011_v9 = vpop.eup %1010 }
 0x136   :  { %v258_v10 = vadd.f32 1.0, %v1011_v9  ;;  %v259_v11 = vmul.f32 0.5, %v257_v8 }
 0x138   :  { %v260_v12 = vmul.f32 0.5, %v258_v10  ;;  %v261_v16 = vmul.f32 %v259_v11, %v239_v58 }
 0x139   :  { %v910_v13 = vpop.f32.mrb[4].mxu0 }
 0x13a   :  { %v911_v15 = vpop.f32.mrb[5].mxu0  ;;  %v262_v17 = vmul.f32 %v260_v12, %v242_v61  ;;  %v780_v61 = vsub.s32 0, %v779_v60 }
 0x13b   :  { %v912_v18 = vadd.f32 %v911_v15, %v910_v13  ;;  %v913_v19 = vpop.f32.mrb[6].mxu0 }
 0x13c   :  { %v914_v21 = vpop.f32.mrb[7].mxu0  ;;  %v267_v22 = vpack.c.bf16 %v262_v17, %v261_v16  ;;  %v781_v0 = vrot.slane %v776_v62, %v780_v61 }
 0x13d   :  { %v590_v24 = vadd.f32 %v912_v18, %v839_v14  ;;  %v915_v25 = vadd.f32 %v914_v21, %v913_v19 }
 0x13e   :  { %400 = vmatmul.mubr.bf16.vlgmr.msra.gmra.mrb[0].mxu1 %v267_v22 }
 0x13f   :  { %v596_v26 = vmul.f32 %v590_v24, %v590_v24  ;;  %v593_v27 = vadd.f32 %v915_v25, %v839_v14  ;;  %719 = vmatpush1.bf16.msra.mxu1 %v984_v20  ;;  %750 = vmatprep.mubr.bf16.mxu1 %v1068_v51 }
 0x140   :  { %720 = vmatprep.subr.bf16.mxu1 %v989_v23 }
 0x141   :  { %v598_v30 = vmul.f32 %v596_v26, %v590_v24  ;;  %v597_v31 = vmul.f32 %v593_v27, %v593_v27 }
 0x143   :  { %v600_v32 = vmul.f32 0.044715, %v598_v30  ;;  %v599_v33 = vmul.f32 %v597_v31, %v593_v27  ;;  %721 = vmatpush1.bf16.msra.mxu1 %v987_v28 }
 0x144   :  { %722 = vmatprep.subr.bf16.mxu1 %v992_v29 }
 0x145   :  { %v602_v36 = vadd.f32 %v600_v32, %v590_v24  ;;  %v601_v37 = vmul.f32 0.044715, %v599_v33 }
 0x147   :  { %v604_v38 = vmul.f32 0.7978846, %v602_v36  ;;  %v603_v39 = vadd.f32 %v601_v37, %v593_v27  ;;  %723 = vmatpush1.bf16.msra.mxu1 %v990_v34 }
 0x148   :  { %724 = vmatprep.subr.bf16.mxu1 %v995_v35 }
 0x149   :  { %1012 = vtanh.f32 %v604_v38  ;;  %v605_v42 = vmul.f32 0.7978846, %v603_v39 }
 0x14b   :  { %1014 = vtanh.f32 %v605_v42  ;;  %725 = vmatpush1.bf16.msra.mxu1 %v993_v40 }
 0x14c   :  { %726 = vmatprep.subr.bf16.mxu1 %v998_v41 }
 0x14f   :  { %727 = vmatpush1.bf16.msra.mxu1 %v996_v43 }
 0x150   :  { %728 = vmatprep.subr.bf16.mxu1 %v1001_v44 }
 0x153   :  { %v1013_v47 = vpop.eup %1012  ;;  %729 = vmatpush1.bf16.msra.mxu1 %v999_v45 }
 0x154   :  { %730 = vmatprep.subr.bf16.mxu1 %v1004_v46  ;;  %v608_v50 = vadd.f32 1.0, %v1013_v47 }
 0x155   :  { %v1015_v51 = vpop.eup %1014 }
 0x156   :  { %v609_v52 = vadd.f32 1.0, %v1015_v51  ;;  %v610_v53 = vmul.f32 0.5, %v608_v50 }
 0x157   :  { %731 = vmatpush1.bf16.msra.mxu1 %v1002_v48 }
 0x158   :  { %732 = vmatprep.subr.bf16.mxu1 %v1007_v49  ;;  %v611_v55 = vmul.f32 0.5, %v609_v52  ;;  %v612_v56 = vmul.f32 %v610_v53, %v590_v24 }
 0x15a   :  { %v613_v57 = vmul.f32 %v611_v55, %v593_v27 }
 0x15b   :  { %733 = vmatpush1.bf16.msra.mxu1 %v1005_v54 }
 0x15c   :  { %v618_v58 = vpack.c.bf16 %v613_v57, %v612_v56 }
 0x15e   :  { %751 = vmatmul.mubr.bf16.vlgmr.msra.gmra.mrb[0].mxu1 %v618_v58 }
 0x231   :  { %v752_v2 = vpop.f32.mrb[0].mxu1 }
 0x232   :  { %v788_v3 = vadd.f32 %v781_v0, %v752_v2  ;;  %v754_v4 = vpop.f32.mrb[1].mxu1 }
 0x233   :  { %v789_v5 = vadd.f32 %v785_v1, %v754_v4  ;;  %v756_v6 = vpop.f32.mrb[2].mxu1 }
 0x234   :  { %792 = vst [vmem:[%s1155_s5] sm:$0xff] %v788_v3  ;;  %v790_v7 = vadd.f32 %v781_v0, %v756_v6  ;;  %v758_v8 = vpop.f32.mrb[3].mxu1 }
 0x235   :  { %793 = vst [vmem:[%s1155_s5 + $0x8] sm:$0xff] %v789_v5  ;;  %v791_v9 = vadd.f32 %v785_v1, %v758_v8 }
 0x236   :  { %794 = vst [vmem:[%s1155_s5 + $0x10] sm:$0xff] %v790_v7 }
 0x237   :  { %795 = vst [vmem:[%s1155_s5 + $0x18] sm:$0xff] %v791_v9 }
 0x238   :  { %800 = vsyncpa [#allocation4], 1 }
 0x239   :  { %801 = vsyncpa [#allocation6], 1 }

</bundles_post_ra>
